<compile_context>
chip_gen: v5e
topology: v5e:2x2
jax: 0.10.0
libtpu: 0.0.40
codegen_flags: <defaults>
</compile_context>

<pallas_src>
import jax
import jax.numpy as jnp
from jax.experimental import pallas as pl
from jax.experimental.pallas import tpu as pltpu

EPS = 1e-7
_LANE = 128


def _vmem_limit_bytes():
    """Scoped-VMEM request, sized per generation with headroom for Mosaic."""
    try:
        phys = int(pltpu.get_tpu_info().vmem_capacity_bytes)
    except Exception:
        phys = 64 << 20  # conservative (v7x per-TC) fallback
    return max(32 << 20, min(phys - (16 << 20), 112 << 20))


def _pick_spatial_tile(hw, c_pad, in_itemsize, tile_budget_bytes):
    """Spatial lane-width per grid step.

    Footprint model per lane of tile width:
      * 2 inputs x 2 pipeline buffers in the native dtype, plus
      * ~4 live fp32 elementwise temporaries (casts, e, pr, pr*gt).
    The (3, C, 1) accumulator is negligible and excluded.
    The tile is additionally capped at ~8 MiB of streamed input per step
    (enough to amortize the fixed per-step overhead even at v7x HBM rates),
    and floored at 128 lanes (never fall back to full HW when VMEM is tight).
    """
    bytes_per_lane = 2 * 2 * c_pad * in_itemsize + 4 * c_pad * 4
    thw_vmem = (int(tile_budget_bytes // bytes_per_lane) // _LANE) * _LANE

    target_in_bytes = 8 << 20
    thw_target = -(-target_in_bytes // (2 * c_pad * in_itemsize))  # ceil
    thw_target = -(-thw_target // _LANE) * _LANE                   # ceil to 128

    thw = min(thw_vmem, thw_target)
    thw = max(thw, _LANE)   # minimum legal lane tile; never enlarge to full HW
    if thw >= hw:
        return hw           # single full-width block (block dim == array dim)
    return thw


def jaccard_loss(logits_nchw, target_nchw):
    """JaccardLoss forward.  logits/target: (N, C, H, W) float arrays."""
    N, C, H, W = logits_nchw.shape
    assert target_nchw.shape == logits_nchw.shape
    HW = H * W

    # Free reshapes (no transpose, no extra HBM round-trip): channels on
    # sublanes, spatial positions lane-dense.
    x = logits_nchw.reshape(N, C, HW)
    t = target_nchw.reshape(N, C, HW)

    c_pad = max(8, ((C + 7) // 8) * 8)
    in_itemsize = max(jnp.dtype(x.dtype).itemsize, jnp.dtype(t.dtype).itemsize)
    vmem_limit = _vmem_limit_bytes()
    thw = _pick_spatial_tile(HW, c_pad, in_itemsize, (vmem_limit * 2) // 3)

    n_blocks = pl.cdiv(HW, thw)          # real spatial blocks
    n_split = 2 if n_blocks >= 2 else 1  # core-split axis (helps v7x when N<2)
    n_s = pl.cdiv(n_blocks, n_split)     # blocks per split
    n_full = HW // thw                   # blocks with no padded / ghost lanes
    needs_mask = (n_split * n_s) > n_full

    def kernel(x_ref, t_ref, out_ref, acc_ref):
        h = pl.program_id(1)
        s = pl.program_id(2)

        @pl.when(s == 0)
        def _init():
            acc_ref[...] = jnp.zeros_like(acc_ref)

        xv = x_ref[0].astype(jnp.float32)            # (C, THW)
        tv = t_ref[0].astype(jnp.float32)            # (C, THW)

        # softmax over channels (sublane axis); spatial positions are lanes
        m = jnp.max(xv, axis=0, keepdims=True)       # (1, THW)
        e = jnp.exp(xv - m)
        inv = pl.reciprocal(jnp.sum(e, axis=0, keepdims=True), approx=False)
        pr = e * inv                                 # (C, THW)

        def accum(p, g):
            # Per-tile lane reduction: the cross-vreg adds are VPU work we pay
            # anyway; the final cross-lane reduce rides the (otherwise idle)
            # XLU slot.  Each RMW touches a single narrow vreg per plane.
            acc_ref[0] += jnp.sum(p * g, axis=-1, keepdims=True)   # tp
            acc_ref[1] += jnp.sum(p, axis=-1, keepdims=True)       # sum(pr)
            acc_ref[2] += jnp.sum(g, axis=-1, keepdims=True)       # sum(gt)

        if needs_mask:
            g_blk = h * n_s + s                      # logical spatial block id
            is_edge = g_blk >= n_full                # ragged or ghost block

            @pl.when(jnp.logical_not(is_edge))
            def _fast():
                accum(pr, tv)

            @pl.when(is_edge)
            def _masked():
                lane = jax.lax.broadcasted_iota(jnp.int32, (1, thw), 1)
                valid = (g_blk * thw + lane) < HW
                # mask BOTH planes: junk lanes may hold Inf/NaN -> pr must be
                # zeroed too, not just gt.
                accum(jnp.where(valid, pr, 0.0), jnp.where(valid, tv, 0.0))
        else:
            accum(pr, tv)

        @pl.when(s == pl.num_programs(2) - 1)
        def _finalize():
            out_ref[0, 0] = acc_ref[...]             # (3, C, 1)

    bytes_accessed = int(
        N * C * HW * (jnp.dtype(x.dtype).itemsize + jnp.dtype(t.dtype).itemsize)
        + N * n_split * 3 * C * 4)
    cost = pl.CostEstimate(flops=int(8 * N * C * HW),
                           transcendentals=int(N * C * HW),
                           bytes_accessed=bytes_accessed)

    # Ghost blocks (when n_split*n_s > n_blocks) clamp to the last real block
    # in the index map and are fully masked inside the kernel.
    in_map = lambda b, h, s: (b, 0, jnp.minimum(h * n_s + s, n_blocks - 1))

    partials = pl.pallas_call(
        kernel,
        out_shape=jax.ShapeDtypeStruct((N, n_split, 3, C, 1), jnp.float32),
        grid_spec=pltpu.PrefetchScalarGridSpec(
            num_scalar_prefetch=0,
            grid=(N, n_split, n_s),
            in_specs=[
                pl.BlockSpec((1, C, thw), in_map),
                pl.BlockSpec((1, C, thw), in_map),
            ],
            out_specs=pl.BlockSpec((1, 1, 3, C, 1),
                                   lambda b, h, s: (b, h, 0, 0, 0)),
            scratch_shapes=[pltpu.VMEM((3, C, 1), jnp.float32)],
        ),
        compiler_params=pltpu.CompilerParams(
            dimension_semantics=("parallel", "parallel", "arbitrary"),
            vmem_limit_bytes=vmem_limit,
        ),
        cost_estimate=cost,
    )(x, t)

    # Tiny finalize in plain JAX (keeps batch + core-split axes 'parallel').
    sums = jnp.sum(partials[..., 0], axis=(0, 1))    # (3, C)
    tp, ps, gs = sums[0], sums[1], sums[2]
    fp = ps - tp
    fn = gs - tp
    score = (2.0 * tp + EPS) / (2.0 * tp + fn + fp + EPS)
    return jnp.sum(1.0 - score[1:])                  # classes 1..C-1, as in the module


def _reference_loss(logits, target):
    """Pure-JAX reference mirroring the PyTorch forward."""
    pr = jax.nn.softmax(logits.astype(jnp.float32), axis=1)
    gt = target.astype(jnp.float32)
    total = jnp.float32(0.0)
    for i in range(1, logits.shape[1]):
        p = pr[:, i, :, :]
        g = gt[:, i, :, :]
        tp = jnp.sum(p * g)
        fp = jnp.sum(p) - tp
        fn = jnp.sum(g) - tp
        score = (2.0 * tp + EPS) / (2.0 * tp + fn + fp + EPS)
        total = total + (1.0 - score)
    return total


if __name__ == "__main__":
    # deterministic parameter init (unused in forward, kept for module parity)
    class_weights = jnp.array(1.0, dtype=jnp.float32)  # noqa: F841

    key = jax.random.PRNGKey(0)
    k1, k2 = jax.random.split(key)
    N, C, H, W = 2, 4, 16, 16
    logits = jax.random.normal(k1, (N, C, H, W), dtype=jnp.float32)
    labels = jax.random.randint(k2, (N, H, W), 0, C)
    target = jax.nn.one_hot(labels, C, axis=1, dtype=jnp.float32)  # (N,C,H,W)

    out = jax.block_until_ready(jaccard_loss(logits, target))
    ref = jax.block_until_ready(_reference_loss(logits, target))
    # exact reciprocal in the softmax -> tight tolerance
    assert jnp.allclose(out, ref, rtol=1e-4, atol=1e-4), (out, ref)
    print("KERNEL_OK")
</pallas_src>

<mosaic_0001>
module attributes {stable_mosaic.version = 11 : i64} {
  func.func @kernel(%arg0: i32, %arg1: i32, %arg2: i32, %arg3: memref<1x4x256xf32, #tpu.memory_space<vmem>>, %arg4: memref<1x4x256xf32, #tpu.memory_space<vmem>>, %arg5: memref<1x1x3x4x1xf32, #tpu.memory_space<vmem>>, %arg6: memref<3x4x1xf32, #tpu.memory_space<vmem>>) attributes {dimension_semantics = [#tpu.dimension_semantics<parallel>, #tpu.dimension_semantics<parallel>, #tpu.dimension_semantics<arbitrary>], iteration_bounds = array<i64: 2, 1, 1>, scalar_prefetch = 0 : i64, scratch_operands = 1 : i64, tpu.core_type = #tpu.core_type<tc>, window_params = [{transform_indices = @transform_0, window_bounds = array<i64: 1, 4, 256>}, {transform_indices = @transform_1, window_bounds = array<i64: 1, 4, 256>}, {transform_indices = @transform_2, window_bounds = array<i64: 1, 1, 3, 4, 1>}]} {
    %c0_i32 = arith.constant 0 : i32
    %0 = arith.cmpi eq, %arg2, %c0_i32 : i32
    %1 = arith.extui %0 : i1 to i32
    %c0_i32_0 = arith.constant 0 : i32
    %2 = arith.cmpi ne, %1, %c0_i32_0 : i32
    scf.if %2 {
      %cst_28 = arith.constant 0.000000e+00 : f32
      %45 = vector.broadcast %cst_28 : f32 to vector<3x4x1xf32>
      %c0_29 = arith.constant 0 : index
      %c0_30 = arith.constant 0 : index
      %c0_31 = arith.constant 0 : index
      %46 = vector.load %arg6[%c0_29, %c0_30, %c0_31] : memref<3x4x1xf32, #tpu.memory_space<vmem>>, vector<3x4x1xf32>
      tpu.vector_store %arg6[%c0_29, %c0_30, %c0_31], %45 {strides = array<i32>} : memref<3x4x1xf32, #tpu.memory_space<vmem>>, vector<3x4x1xf32>,
    } else {
    }
    %c0 = arith.constant 0 : index
    %c0_1 = arith.constant 0 : index
    %c0_2 = arith.constant 0 : index
    %3 = vector.load %arg3[%c0, %c0_1, %c0_2] : memref<1x4x256xf32, #tpu.memory_space<vmem>>, vector<1x4x256xf32>
    %4 = vector.shape_cast %3 : vector<1x4x256xf32> to vector<4x256xf32>
    %c0_3 = arith.constant 0 : index
    %c0_4 = arith.constant 0 : index
    %c0_5 = arith.constant 0 : index
    %5 = vector.load %arg4[%c0_3, %c0_4, %c0_5] : memref<1x4x256xf32, #tpu.memory_space<vmem>>, vector<1x4x256xf32>
    %6 = vector.shape_cast %5 : vector<1x4x256xf32> to vector<4x256xf32>
    %cst = arith.constant dense<0xFF800000> : vector<256xf32>
    %7 = vector.multi_reduction <maximumf>, %4, %cst [0] : vector<4x256xf32> to vector<256xf32>
    %8 = vector.shape_cast %7 : vector<256xf32> to vector<1x256xf32>
    %9 = vector.broadcast %8 : vector<1x256xf32> to vector<4x256xf32>
    %10 = arith.subf %4, %9 : vector<4x256xf32>
    %11 = math.exp %10 : vector<4x256xf32>
    %cst_6 = arith.constant dense<0.000000e+00> : vector<256xf32>
    %12 = vector.multi_reduction <add>, %11, %cst_6 [0] : vector<4x256xf32> to vector<256xf32>
    %13 = vector.shape_cast %12 : vector<256xf32> to vector<1x256xf32>
    %14 = tpu.reciprocal %13 : vector<1x256xf32> -> vector<1x256xf32>
    %15 = vector.broadcast %14 : vector<1x256xf32> to vector<4x256xf32>
    %16 = arith.mulf %11, %15 : vector<4x256xf32>
    %c0_7 = arith.constant 0 : index
    %c0_8 = arith.constant 0 : index
    %c0_9 = arith.constant 0 : index
    %17 = vector.load %arg6[%c0_7, %c0_8, %c0_9] : memref<3x4x1xf32, #tpu.memory_space<vmem>>, vector<1x4x1xf32>
    %18 = vector.shape_cast %17 : vector<1x4x1xf32> to vector<4x1xf32>
    %19 = arith.mulf %16, %6 : vector<4x256xf32>
    %cst_10 = arith.constant dense<0.000000e+00> : vector<4xf32>
    %20 = vector.multi_reduction <add>, %19, %cst_10 [1] : vector<4x256xf32> to vector<4xf32>
    %21 = vector.shape_cast %20 : vector<4xf32> to vector<4x1xf32>
    %22 = arith.addf %18, %21 : vector<4x1xf32>
    %c0_11 = arith.constant 0 : index
    %c0_12 = arith.constant 0 : index
    %c0_13 = arith.constant 0 : index
    %23 = vector.load %arg6[%c0_11, %c0_12, %c0_13] : memref<3x4x1xf32, #tpu.memory_space<vmem>>, vector<1x4x1xf32>
    %24 = vector.shape_cast %23 : vector<1x4x1xf32> to vector<4x1xf32>
    %25 = vector.shape_cast %22 : vector<4x1xf32> to vector<1x4x1xf32>
    tpu.vector_store %arg6[%c0_11, %c0_12, %c0_13], %25 {strides = array<i32>} : memref<3x4x1xf32, #tpu.memory_space<vmem>>, vector<1x4x1xf32>,
    %c1 = arith.constant 1 : index
    %c0_14 = arith.constant 0 : index
    %c0_15 = arith.constant 0 : index
    %26 = vector.load %arg6[%c1, %c0_14, %c0_15] : memref<3x4x1xf32, #tpu.memory_space<vmem>>, vector<1x4x1xf32>
    %27 = vector.shape_cast %26 : vector<1x4x1xf32> to vector<4x1xf32>
    %cst_16 = arith.constant dense<0.000000e+00> : vector<4xf32>
    %28 = vector.multi_reduction <add>, %16, %cst_16 [1] : vector<4x256xf32> to vector<4xf32>
    %29 = vector.shape_cast %28 : vector<4xf32> to vector<4x1xf32>
    %30 = arith.addf %27, %29 : vector<4x1xf32>
    %c1_17 = arith.constant 1 : index
    %c0_18 = arith.constant 0 : index
    %c0_19 = arith.constant 0 : index
    %31 = vector.load %arg6[%c1_17, %c0_18, %c0_19] : memref<3x4x1xf32, #tpu.memory_space<vmem>>, vector<1x4x1xf32>
    %32 = vector.shape_cast %31 : vector<1x4x1xf32> to vector<4x1xf32>
    %33 = vector.shape_cast %30 : vector<4x1xf32> to vector<1x4x1xf32>
    tpu.vector_store %arg6[%c1_17, %c0_18, %c0_19], %33 {strides = array<i32>} : memref<3x4x1xf32, #tpu.memory_space<vmem>>, vector<1x4x1xf32>,
    %c2 = arith.constant 2 : index
    %c0_20 = arith.constant 0 : index
    %c0_21 = arith.constant 0 : index
    %34 = vector.load %arg6[%c2, %c0_20, %c0_21] : memref<3x4x1xf32, #tpu.memory_space<vmem>>, vector<1x4x1xf32>
    %35 = vector.shape_cast %34 : vector<1x4x1xf32> to vector<4x1xf32>
    %cst_22 = arith.constant dense<0.000000e+00> : vector<4xf32>
    %36 = vector.multi_reduction <add>, %6, %cst_22 [1] : vector<4x256xf32> to vector<4xf32>
    %37 = vector.shape_cast %36 : vector<4xf32> to vector<4x1xf32>
    %38 = arith.addf %35, %37 : vector<4x1xf32>
    %c2_23 = arith.constant 2 : index
    %c0_24 = arith.constant 0 : index
    %c0_25 = arith.constant 0 : index
    %39 = vector.load %arg6[%c2_23, %c0_24, %c0_25] : memref<3x4x1xf32, #tpu.memory_space<vmem>>, vector<1x4x1xf32>
    %40 = vector.shape_cast %39 : vector<1x4x1xf32> to vector<4x1xf32>
    %41 = vector.shape_cast %38 : vector<4x1xf32> to vector<1x4x1xf32>
    tpu.vector_store %arg6[%c2_23, %c0_24, %c0_25], %41 {strides = array<i32>} : memref<3x4x1xf32, #tpu.memory_space<vmem>>, vector<1x4x1xf32>,
    %c0_i32_26 = arith.constant 0 : i32
    %42 = arith.cmpi eq, %arg2, %c0_i32_26 : i32
    %43 = arith.extui %42 : i1 to i32
    %c0_i32_27 = arith.constant 0 : i32
    %44 = arith.cmpi ne, %43, %c0_i32_27 : i32
    scf.if %44 {
      %c0_28 = arith.constant 0 : index
      %c0_29 = arith.constant 0 : index
      %c0_30 = arith.constant 0 : index
      %45 = vector.load %arg6[%c0_28, %c0_29, %c0_30] : memref<3x4x1xf32, #tpu.memory_space<vmem>>, vector<3x4x1xf32>
      %c0_31 = arith.constant 0 : index
      %c0_32 = arith.constant 0 : index
      %c0_33 = arith.constant 0 : index
      %c0_34 = arith.constant 0 : index
      %c0_35 = arith.constant 0 : index
      %46 = vector.load %arg5[%c0_31, %c0_32, %c0_33, %c0_34, %c0_35] : memref<1x1x3x4x1xf32, #tpu.memory_space<vmem>>, vector<1x1x3x4x1xf32>
      %47 = vector.shape_cast %46 : vector<1x1x3x4x1xf32> to vector<3x4x1xf32>
      %48 = vector.shape_cast %45 : vector<3x4x1xf32> to vector<1x1x3x4x1xf32>
      tpu.vector_store %arg5[%c0_31, %c0_32, %c0_33, %c0_34, %c0_35], %48 {strides = array<i32>} : memref<1x1x3x4x1xf32, #tpu.memory_space<vmem>>, vector<1x1x3x4x1xf32>,
    } else {
    }
    return
  }
  func.func @transform_0(%arg0: i32, %arg1: i32, %arg2: i32) -> (i32, i32, i32) {
    %c1_i32 = arith.constant 1 : i32
    %0 = arith.muli %arg1, %c1_i32 : i32
    %1 = arith.addi %0, %arg2 : i32
    %c0_i32 = arith.constant 0 : i32
    %2 = arith.minsi %1, %c0_i32 : i32
    %c0_i32_0 = arith.constant 0 : i32
    %c0_i32_1 = arith.constant 0 : i32
    return %arg0, %c0_i32_0, %2 : i32, i32, i32
  }
  func.func @transform_1(%arg0: i32, %arg1: i32, %arg2: i32) -> (i32, i32, i32) {
    %c1_i32 = arith.constant 1 : i32
    %0 = arith.muli %arg1, %c1_i32 : i32
    %1 = arith.addi %0, %arg2 : i32
    %c0_i32 = arith.constant 0 : i32
    %2 = arith.minsi %1, %c0_i32 : i32
    %c0_i32_0 = arith.constant 0 : i32
    %c0_i32_1 = arith.constant 0 : i32
    return %arg0, %c0_i32_0, %2 : i32, i32, i32
  }
  func.func @transform_2(%arg0: i32, %arg1: i32, %arg2: i32) -> (i32, i32, i32, i32, i32) {
    %c0_i32 = arith.constant 0 : i32
    %c0_i32_0 = arith.constant 0 : i32
    %c0_i32_1 = arith.constant 0 : i32
    %c0_i32_2 = arith.constant 0 : i32
    return %arg0, %arg1, %c0_i32, %c0_i32_0, %c0_i32_1 : i32, i32, i32, i32, i32
  }
}

</mosaic_0001>

<bundles_post_ra>
// kernel: tpu_custom_call.1
= control target key start
LH: loop header
LB: loop body
LE: loop exit
PB: predicated region body
PF: predicated region fallthrough
CT: control target
= control target key end

     0   :  { %7 = vsyncpa [#allocation4], 0  ;;  %s879_s0 = inlined_call_operand.hbm [shape: f32[2,4,256], index: 0, kind: input, shape index: {}]   ;;  %s880_s1 = inlined_call_operand.hbm [shape: f32[2,4,256], index: 1, kind: input, shape index: {}]   ;;  %s881_s2 = inlined_call_operand.vmem [shape: f32[2,1,3,4,1], index: 2, kind: output, shape index: {}]  }
   0x1   :  { %9 = vsyncpa [#allocation4 + $0x1], 0 }
   0x2   :  { %10 = vsyncpa [#allocation6], 0 }
   0x3   :  { %12 = vsyncpa [#allocation6 + $0x1], 0  ;;  %s760_s9 = smov 0   ;;  %s762_s10 = smov 0  }
   0x4   :  { %s764_s11 = smov 0   ;;  %s766_s12 = smov 0  }
   0x5   :  { %s768_s13 = smov 0   ;;  %s770_s14 = smov 0  }
   0x6 LB: > { %s542_s15 = sadd.s32 4294967295, %s742_s14   ;;  %s37_s16 = sadd.s32 1, %s738_s13  ;;  %s742_s14 = sphi %s770_s14, %s18_s14   ;;  %s738_s13 = sphi %s768_s13, %s888_s13   ;;  %s734_s12 = sphi %s766_s12, %s887_s12   ;;  %s730_s11 = sphi %s764_s11, %s886_s11   ;;  %s726_s10 = sphi %s762_s10, %s885_s10   ;;  %s722_s9 = sphi %s760_s9, %s884_s9  }
   0x7   : > { %p39_p0 = scmp.ge.s32.totalorder %s37_s16, 2  ;;  %s52_s17 = sadd.s32 1, %s730_s11 }
   0x8   : > { %p59_p1 = scmp.ne.s32.totalorder %s730_s11, %s726_s10  ;;  %p60_p2 = scmp.eq.s32.totalorder %s742_s14, 0 }
   0x9   : > { %s890_s16 = smov (%p39_p0, %s37_s16), 0  ;;  %p65_p4 = scmp.ne.s32.totalorder %s726_s10, %s722_s9 }
   0xa   : > { %p796_p3 = por %p60_p2, %p59_p1  ;;  %s47_s19 = ssub.s32 %s738_s13, %s890_s16 }
   0xb   : > { %p66_p5 = scmp.eq.s32.totalorder %s542_s15, 0  ;;  %p50_p6 = scmp.eq.s32.totalorder %s47_s19, 0 }
   0xc   : > { %p572_p8 = scmp.lt.s32.totalorder %s742_s14, 2  ;;  %s151_s22 = sand.u32 1, %s730_s11  }
   0xd   : > { %p803_p7 = por %p66_p5, %p65_p4  ;;  %s558_s23 = sshll.u32 %s738_s13, 3 }
   0xe   : > { %s809_s21 = scalar_select %p50_p6, %s730_s11, %s52_s17  }
   0xf   : > { %s546_s24 = sshll.u32 %s151_s22, 3  ;;  %s165_s27 = scalar_lea.hbm %s879_s0, %s558_s23 }
  0x10   : > { %s167_s28 = sshll.u32 %s165_s27, 4  ;;  %s155_s29 = scalar_lea.vmem [#allocation3], %s546_s24  ;;  %s168_s28 = int_to_ptr.hbm [resolvable:$true] %s167_s28 }
  0x11   : > { %s169_s30 = sshll.u32 %s155_s29, 4  ;;  %p566_p9 = pnand %p572_p8, %p796_p3  ;;  %s170_s30 = int_to_ptr.vmem [resolvable:$true] %s169_s30 }
  0x12   : > { %p552_p10 = scmp.ge.s32.totalorder %s742_s14, 1  ;;  %p199_p11 = scmp.lt.s32.totalorder %s742_s14, 3 }
  0x13   : > { %s152_s3 = scalar_lea.sflag [#allocation4], %s151_s22  ;;  %s190_s6 = scalar_lea.hbm %s880_s1, %s558_s23 }
  0x14   : > { %568 = dma.hbm_to_vmem [thread:$0]  (!%p566_p9), %s168_s28, 128, %s170_s30, %s152_s3  }
  0x15   : > { %p200_p12 = pnand %p552_p10, %p199_p11  ;;  %s192_s7 = sshll.u32 %s190_s6, 4  ;;  %s193_s7 = int_to_ptr.hbm [resolvable:$true] %s192_s7 }
  0x16   : > { %s180_s8 = scalar_lea.vmem [#allocation5], %s546_s24  ;;  %s177_s15 = scalar_lea.sflag [#allocation6], %s151_s22 }
  0x17   : > { %s194_s9 = sshll.u32 %s180_s8, 4  ;;  %203 = sbr.rel (%p200_p12) target bundleno = 267 (0x10b), region = 28  ;;  %s195_s9 = int_to_ptr.vmem [resolvable:$true] %s194_s9 }
  0x18   : > { %571 = dma.hbm_to_vmem [thread:$0]  (!%p566_p9), %s193_s7, 128, %s195_s9, %s177_s15  }
  0x19   : > { %s205_s17 = sand.u32 (!%p200_p12), 1, %s726_s10  }
  0x1a   : > { %s553_s18 = sshll.u32 (!%p200_p12), %s205_s17, 3  ;;  %s206_s19 = scalar_lea.sflag (!%p200_p12), [#allocation4], %s205_s17 }
  0x1b   : > { %s209_s25 = scalar_lea.vmem (!%p200_p12), [#allocation3], %s553_s18 }
  0x1c   : > { %713 = dma.done.wait (%p803_p7), %s206_s19, 128  }
  0x1d   : > { %715 = vsyncadd (%p803_p7), %s206_s19, 4294967168  ;;  %s216_s23 = scalar_lea.sflag [#allocation6], %s205_s17  ;;  %s828_s24 = scalar_lea.vmem [#allocation5], %s553_s18 }
  0x1e   : > { %717 = dma.done.wait (%p803_p7), %s216_s23, 128  }
  0x1f   : > { %719 = vsyncadd (%p803_p7), %s216_s23, 4294967168  ;;  %v275_v0 = vld [vmem:[%s209_s25] sm:$0xff]  ;;  %vm283_vm0 = vcmask 1043456   ;;  %v276_v59 = vld [vmem:[%s828_s24] sm:$0xff]  ;;  %vm271_vm9 = vcmask 3072   ;;  %v744_v62 = vmov 0.0  }
  0x20   : > { %278 = vst [vmem:[#allocation1] ss:$2 sm:$0xff] %v275_v0  ;;  %p258_p13 = scmp.lt.s32.totalorder %s734_s12, 1 }
  0x21   : > { %272 = vst.msk [vmem:[#allocation2] sm:$0xf] %vm271_vm9, %v744_v62 }
  0x22   : > { %273 = vst.msk [vmem:[#allocation2 + $0x4] sm:$0xf] %vm271_vm9, %v744_v62  ;;  %s892_s12 = smov (!%p258_p13, %s734_s12), 1 }
  0x23   : > { %274 = vst.msk [vmem:[#allocation2 + $0x8] sm:$0xf] %vm271_vm9, %v744_v62  ;;  %s560_s20 = smul.u32 12, %s892_s12 }
  0x25   : > { %s266_s27 = scalar_lea.vmem %s881_s2, %s560_s20 }
  0x27   : > { %v279_v1 = vld.sshfl [vmem:[#allocation1] sm:$0xff pattern:$0x75316420]  ;;  %v280_v2 = vld.sshfl [vmem:[#allocation1 + $0x8] sm:$0xff pattern:$0x75316420] }
  0x28   : > { %v284_v3 = vsel %vm283_vm0, %v279_v1, -inf  ;;  %v291_v4 = vsel %vm283_vm0, %v280_v2, -inf }
  0x29   : > { %v285_v5 = vrot.slane %v284_v3, 4  ;;  %v292_v6 = vrot.slane %v291_v4, 4 }
  0x2b   : > { %v286_v7 = vmax.f32 %v284_v3, %v285_v5  ;;  %v293_v8 = vmax.f32 %v291_v4, %v292_v6 }
  0x2d   : > { %v287_v9 = vrot.slane %v286_v7, 2  ;;  %v294_v10 = vrot.slane %v293_v8, 2 }
  0x2f   : > { %v288_v11 = vmax.f32 %v286_v7, %v287_v9  ;;  %v295_v12 = vmax.f32 %v293_v8, %v294_v10 }
  0x31   : > { %v289_v13 = vrot.slane %v288_v11, 1  ;;  %v296_v14 = vrot.slane %v295_v12, 1 }
  0x33   : > { %v290_v15 = vmax.f32 %v288_v11, %v289_v13  ;;  %v297_v16 = vmax.f32 %v295_v12, %v296_v14 }
  0x35   : > { %v300_v17 = vrot.slane %v297_v16, 4 }
  0x37   : > { %v301_v18 = vsel %vm283_vm0, %v290_v15, %v300_v17  ;;  %v360_v15 = vld [vmem:[#allocation2] sm:$0xf] }
  0x38   : > { %v303_v19 = vsub.f32 %v275_v0, %v301_v18  ;;  %v377_v18 = vld [vmem:[#allocation2 + $0x4] sm:$0xf] }
  0x3a   : > { %v304_v20 = vmul.f32 1.442695, %v303_v19 }
  0x3c   : > { %622 = vpow2.f32 %v304_v20 }
  0x42   : > { %v623_v21 = vpop.eup %622 }
  0x43   : > { %307 = vst [vmem:[#allocation1] ss:$2 sm:$0xff] %v623_v21 }
  0x4a   : > { %v308_v22 = vld.sshfl [vmem:[#allocation1] sm:$0xff pattern:$0x75316420]  ;;  %v309_v23 = vld.sshfl [vmem:[#allocation1 + $0x8] sm:$0xff pattern:$0x75316420] }
  0x4b   : > { %v312_v24 = vsel %vm283_vm0, %v308_v22, 0.0  ;;  %v319_v25 = vsel %vm283_vm0, %v309_v23, 0.0  ;;  %v392_v22 = vld [vmem:[#allocation2 + $0x8] sm:$0xf] }
  0x4c   : > { %v313_v26 = vrot.slane %v312_v24, 4  ;;  %v320_v27 = vrot.slane %v319_v25, 4 }
  0x4e   : > { %v314_v28 = vadd.f32 %v313_v26, %v312_v24  ;;  %v321_v29 = vadd.f32 %v320_v27, %v319_v25 }
  0x50   : > { %v315_v30 = vrot.slane %v314_v28, 2  ;;  %v322_v31 = vrot.slane %v321_v29, 2 }
  0x52   : > { %v316_v32 = vadd.f32 %v315_v30, %v314_v28  ;;  %v323_v33 = vadd.f32 %v322_v31, %v321_v29 }
  0x54   : > { %v317_v34 = vrot.slane %v316_v32, 1  ;;  %v324_v35 = vrot.slane %v323_v33, 1 }
  0x56   : > { %v318_v36 = vadd.f32 %v317_v34, %v316_v32  ;;  %v325_v37 = vadd.f32 %v324_v35, %v323_v33 }
  0x58   : > { %624 = vrcp.f32 %v318_v36  ;;  %vm331_vm1 = vweird.f32 %v318_v36  ;;  %v335_v41 = vand.u32 2147483647, %v318_v36  ;;  %v337_v44 = vand.u32 2147483648, %v318_v36 }
  0x59   : > { %626 = vrcp.f32 %v325_v37  ;;  %v351_v45 = vand.u32 2147483648, %v325_v37  ;;  %vm345_vm3 = vweird.f32 %v325_v37  ;;  %v349_v47 = vand.u32 2147483647, %v325_v37 }
  0x5a   : > { %v338_v51 = vor.u32 1.1754944e-38, %v337_v44  ;;  %vm336_vm7 = vcmp.eq.f32.partialorder %v335_v41, 8.507059e+37 }
  0x5b   : > { %v352_v52 = vor.u32 1.1754944e-38, %v351_v45  ;;  %vm350_vm8 = vcmp.eq.f32.partialorder %v349_v47, 8.507059e+37 }
  0x5e   : > { %v625_v38 = vpop.eup %624 }
  0x5f   : > { %v627_v39 = vpop.eup %626  ;;  %v327_v40 = vmul.f32 %v625_v38, %v318_v36  ;;  %vm332_vm2 = vweird.f32 %v625_v38 }
  0x60   : > { %v341_v42 = vmul.f32 %v627_v39, %v325_v37  ;;  %vm346_vm4 = vweird.f32 %v627_v39  ;;  %vm333_vm5 = vmor %vm331_vm1, %vm332_vm2 }
  0x61   : > { %v328_v43 = vsub.f32 1.0, %v327_v40  ;;  %vm347_vm6 = vmor %vm345_vm3, %vm346_vm4 }
  0x62   : > { %v342_v46 = vsub.f32 1.0, %v341_v42 }
  0x63   : > { %v329_v48 = vmul.f32 %v625_v38, %v328_v43 }
  0x64   : > { %v343_v49 = vmul.f32 %v627_v39, %v342_v46 }
  0x65   : > { %v330_v50 = vadd.f32 %v625_v38, %v329_v48 }
  0x66   : > { %v344_v53 = vadd.f32 %v627_v39, %v343_v49 }
  0x67   : > { %v334_v54 = vsel %vm333_vm5, %v625_v38, %v330_v50 }
  0x68   : > { %v348_v55 = vsel %vm347_vm6, %v627_v39, %v344_v53  ;;  %v339_v56 = vsel %vm336_vm7, %v338_v51, %v334_v54 }
  0x69   : > { %v353_v57 = vsel %vm350_vm8, %v352_v52, %v348_v55 }
  0x6a   : > { %v356_v58 = vrot.slane %v353_v57, 4 }
  0x6c   : > { %v357_v60 = vsel %vm283_vm0, %v339_v56, %v356_v58 }
  0x6d   : > { %v359_v61 = vmul.f32 %v623_v21, %v357_v60 }
  0x6f   : > { %v361_v63 = vmul.f32 %v359_v61, %v276_v59 }
  0x71   : > { %363 = vst [vmem:[#allocation1] ss:$2 sm:$0xff] %v361_v63 }
  0x78   : > { %v364_v0 = vld.sshfl [vmem:[#allocation1] sm:$0xff pattern:$0x75316420]  ;;  %v365_v1 = vld.sshfl [vmem:[#allocation1 + $0x8] sm:$0xff pattern:$0x75316420] }
  0x79   : > { %v368_v2 = vsel %vm283_vm0, %v364_v0, 0.0  ;;  %v369_v3 = vsel %vm283_vm0, %v365_v1, 0.0  ;;  %379 = vst [vmem:[#allocation1] ss:$2 sm:$0xff] %v359_v61 }
  0x7a   : > { %v370_v4 = vadd.f32 %v369_v3, %v368_v2 }
  0x7c   : > { %371 = vadd.xlane.f32.xlu0 %v370_v4 }
  0x80   : > { %v380_v5 = vld.sshfl [vmem:[#allocation1] sm:$0xff pattern:$0x75316420]  ;;  %v381_v6 = vld.sshfl [vmem:[#allocation1 + $0x8] sm:$0xff pattern:$0x75316420] }
  0x81   : > { %394 = vst [vmem:[#allocation1] ss:$2 sm:$0xff] %v276_v59  ;;  %v384_v7 = vsel %vm283_vm0, %v380_v5, 0.0  ;;  %v385_v8 = vsel %vm283_vm0, %v381_v6, 0.0 }
  0x82   : > { %v386_v9 = vadd.f32 %v385_v8, %v384_v7 }
  0x84   : > { %387 = vadd.xlane.f32.xlu0 %v386_v9 }
  0x88   : > { %v395_v10 = vld.sshfl [vmem:[#allocation1] sm:$0xff pattern:$0x75316420]  ;;  %v396_v11 = vld.sshfl [vmem:[#allocation1 + $0x8] sm:$0xff pattern:$0x75316420] }
  0x89   : > { %v399_v12 = vsel %vm283_vm0, %v395_v10, 0.0  ;;  %v400_v13 = vsel %vm283_vm0, %v396_v11, 0.0 }
  0x8a   : > { %v401_v14 = vadd.f32 %v400_v13, %v399_v12 }
  0x8c   : > { %402 = vadd.xlane.f32.xlu1 %v401_v14 }
  0xef   : > { %v372_v16 = vpop.xlane.xlu0 %371 }
  0xf0   : > { %v373_v17 = vadd.f32 %v372_v16, %v360_v15 }
  0xf2   : > { %375 = vst.msk [vmem:[#allocation2] sm:$0xf] %vm271_vm9, %v373_v17 }
  0xf7   : > { %v388_v19 = vpop.xlane.xlu0 %387 }
  0xf8   : > { %v389_v20 = vadd.f32 %v388_v19, %v377_v18 }
  0xf9   : > { %v409_v21 = vld [vmem:[#allocation2] sm:$0xf] }
  0xfa   : > { %412 = vst.msk [vmem:[%s266_s27] sm:$0xf] %vm271_vm9, %v409_v21 }
  0xfb   : > { %390 = vst.msk [vmem:[#allocation2 + $0x4] sm:$0xf] %vm271_vm9, %v389_v20 }
  0xff   : > { %v403_v23 = vpop.xlane.xlu1 %402 }
 0x100   : > { %v404_v24 = vadd.f32 %v403_v23, %v392_v22 }
 0x102   : > { %405 = vst.msk [vmem:[#allocation2 + $0x8] sm:$0xf] %vm271_vm9, %v404_v24  ;;  %v410_v25 = vld [vmem:[#allocation2 + $0x4] sm:$0xf] }
 0x103   : > { %413 = vst.msk [vmem:[%s266_s27 + $0x4] sm:$0xf] %vm271_vm9, %v410_v25 }
 0x109   : > { %v411_v26 = vld [vmem:[#allocation2 + $0x8] sm:$0xf] }
 0x10a   : > { %414 = vst.msk [vmem:[%s266_s27 + $0x8] sm:$0xf] %vm271_vm9, %v411_v26 }
 0x10b PF: > { %s18_s14 = sadd.s32 1, %s742_s14   ;;  %s884_s9 = smov %s726_s10 }
 0x10c   : > { %p15_p0 = scmp.ge.s32.totalorder %s18_s14, 4   ;;  %s885_s10 = smov %s730_s11 }
 0x10d   : > { %s886_s11 = smov %s809_s21  ;;  %s887_s12 = smov %s738_s13 }
 0x10e   : > { %s888_s13 = smov %s890_s16  ;;  %17 = sbr.rel (!%p15_p0) target bundleno = 6 (0x6), region = 91 }
 0x113   :  { %444 = vsyncpa [#allocation4], 1 }
 0x114   :  { %446 = vsyncpa [#allocation4 + $0x1], 1 }
 0x115   :  { %447 = vsyncpa [#allocation6], 1 }
 0x116   :  { %449 = vsyncpa [#allocation6 + $0x1], 1 }

</bundles_post_ra>
